<compile_context>
chip_gen: v5e
topology: v5e:2x2
jax: 0.10.0
libtpu: 0.0.40
codegen_flags: <defaults>
</compile_context>

<pallas_src>
import functools
import math

import jax
import jax.numpy as jnp
from jax import lax
from jax.experimental import pallas as pl
from jax.experimental.pallas import tpu as pltpu


def _dual_head_kernel(
    x_ref,       # (B_TILE, S, H)   compute dtype, native (N, S, H) layout
    wt1_ref,     # (H, 2*C1)        conv1 tap-1 weights [head | tail], compute dtype
    wt0_ref,     # (H, 2*C1)        conv1 tap-0 weights [head | tail], compute dtype
    b1_ref,      # (1, 2*C1)        f32 conv1 bias       [head | tail]
    v_ref,       # (2*C1, 8)        fused conv2+dense weights, compute dtype
                 #                  cols: [v1_head, v0_head, v1_tail, v0_tail, 0,0,0,0]
    beff_ref,    # (1, 2)           f32 fused conv2+dense bias [head, tail]
    o_head_ref,  # (B_TILE*S, 1)    f32
    o_tail_ref,  # (B_TILE*S, 1)    f32
    *,
    negative_slope,
):
    bt, s, h = x_ref.shape
    rows = bt * s

    # Batch-stack the tile: (B_TILE, S, H) -> (B_TILE*S, H).  Only leading dims
    # are collapsed, so the load keeps its lane-major (H) layout.
    x = x_ref[...].reshape(rows, h)

    # ---- Stage 1: Conv1dSame(H, 128, K=2) for BOTH branches, output-shift form.
    #   h1_pre[r] = W_tap1^T x[r] + W_tap0^T x[r-1] + b1   (x[r-1] == 0 at l == 0)
    a1 = jnp.dot(x, wt1_ref[...], preferred_element_type=jnp.float32)   # (rows, 2*C1)
    a0 = jnp.dot(x, wt0_ref[...], preferred_element_type=jnp.float32)   # (rows, 2*C1)

    # Row r corresponds to (batch b, position l) with l = r % S.  Positions with
    # l == 0 must see a zero "previous column" (the conv's zero padding); this
    # mask also kills the roll wrap-around and cross-batch-element leakage.
    row_ids = lax.broadcasted_iota(jnp.int32, (rows, 1), 0)
    not_first = (row_ids % s) != 0                                       # (rows, 1)

    a0_shift = jnp.where(not_first, pltpu.roll(a0, shift=1, axis=0), 0.0)
    h1 = a1 + a0_shift + b1_ref[...]
    h1 = jnp.where(h1 >= 0, h1, h1 * negative_slope)                     # LeakyReLU, f32

    # ---- Stage 2: Conv1dSame(128, 64, K=2) + Linear(64, 1) fused algebraically:
    #   logit[r] = v1 . h1[r] + v0 . h1[r-1] + b_eff
    s4 = jnp.dot(h1.astype(v_ref.dtype), v_ref[...],
                 preferred_element_type=jnp.float32)                     # (rows, 8)
    s4_shift = jnp.where(not_first, pltpu.roll(s4, shift=1, axis=0), 0.0)

    beff = beff_ref[...]                                                 # (1, 2)
    o_head_ref[...] = s4[:, 0:1] + s4_shift[:, 1:2] + beff[:, 0:1]
    o_tail_ref[...] = s4[:, 2:3] + s4_shift[:, 3:4] + beff[:, 1:2]


def _pick_b_tile(n, requested, compute_dtype):
    if requested is None:
        bt = 8 if jnp.dtype(compute_dtype).itemsize <= 2 else 4
    else:
        bt = int(requested)
    bt = max(1, min(bt, n))
    # v7x has 2 TensorCores per chip: keep >= 2 tiles on the "parallel" grid axis
    # whenever possible so both cores get work.
    if n >= 2 and -(-n // bt) < 2:
        bt = -(-n // 2)
    return bt


def roberta_dual_head_forward(hidden_states, params, *, compute_dtype=jnp.bfloat16,
                              b_tile=None):
    """Everything after `outputs[0]` in the PyTorch forward (inference mode).

    hidden_states: (N, S, H) RoBERTa encoder sequence output, consumed in its
    native layout — the torch.transpose(1, 2) is folded into the matmul
    orientation instead of materializing a transposed copy in HBM.
    Returns (logits_head, logits_tail), each (N, S) float32 (the `.squeeze()`).

    Note: on v6e (128 MiB VMEM) b_tile=16 is a reasonable override for the bf16
    path; do NOT use it on v7x (64 MiB VMEM).
    """
    # TODO(synk): the RobertaModel backbone (embeddings + transformer encoder +
    # pooler, pretrained weights) is not re-implemented; this consumes its output.
    # TODO(synk): nn.Dropout(0.2) is treated as identity (inference mode only).
    n, s, h = hidden_states.shape
    c1 = params["conv_head_w"].shape[0]       # 128
    cdt = jnp.dtype(compute_dtype)

    x = hidden_states.astype(compute_dtype)                              # (N, S, H)

    # Stage-1 weights: per-tap, output columns stacked [head | tail].
    wt1 = jnp.concatenate([params["conv_head_w"][:, :, 1],
                           params["conv_tail_w"][:, :, 1]],
                          axis=0).T.astype(compute_dtype)                # (H, 2*C1)
    wt0 = jnp.concatenate([params["conv_head_w"][:, :, 0],
                           params["conv_tail_w"][:, :, 0]],
                          axis=0).T.astype(compute_dtype)                # (H, 2*C1)
    b1 = jnp.concatenate([params["conv_head_b"], params["conv_tail_b"]]
                         ).reshape(1, 2 * c1).astype(jnp.float32)

    # Conv2 + Linear(64, 1) fused algebraically, precomputed in f32.
    wdh = params["dense_head_w"].astype(jnp.float32).reshape(-1)         # (C2,)
    wdt = params["dense_tail_w"].astype(jnp.float32).reshape(-1)
    w2h = params["conv_head2_w"].astype(jnp.float32)                     # (C2, C1, 2)
    w2t = params["conv_tail2_w"].astype(jnp.float32)
    zeros_c1 = jnp.zeros((c1,), jnp.float32)
    zeros_2c1 = jnp.zeros((2 * c1,), jnp.float32)
    v = jnp.stack([
        jnp.concatenate([wdh @ w2h[:, :, 1], zeros_c1]),                 # s1_head
        jnp.concatenate([wdh @ w2h[:, :, 0], zeros_c1]),                 # s0_head
        jnp.concatenate([zeros_c1, wdt @ w2t[:, :, 1]]),                 # s1_tail
        jnp.concatenate([zeros_c1, wdt @ w2t[:, :, 0]]),                 # s0_tail
        zeros_2c1, zeros_2c1, zeros_2c1, zeros_2c1,
    ], axis=1).astype(compute_dtype)                                     # (2*C1, 8)
    beff = jnp.stack([
        wdh @ params["conv_head2_b"].astype(jnp.float32)
        + params["dense_head_b"].astype(jnp.float32)[0],
        wdt @ params["conv_tail2_b"].astype(jnp.float32)
        + params["dense_tail_b"].astype(jnp.float32)[0],
    ]).reshape(1, 2)

    b_tile = _pick_b_tile(n, b_tile, compute_dtype)
    n_tiles = -(-n // b_tile)
    n_pad = n_tiles * b_tile
    if n_pad != n:
        x = jnp.pad(x, ((0, n_pad - n), (0, 0), (0, 0)))

    rows = b_tile * s
    # VMEM budget: x block double-buffered + the f32 (rows, 2*C1) working slabs.
    x_block_bytes = rows * h * cdt.itemsize
    slab_bytes = rows * (2 * c1) * 4
    weight_bytes = (wt1.size + wt0.size + v.size) * cdt.itemsize + b1.size * 4 + 8
    est = 3 * x_block_bytes + 5 * slab_bytes + weight_bytes + (2 << 20)
    vmem_limit = int(min(100 * 1024 * 1024, max(40 * 1024 * 1024, 1.25 * est)))

    flops = int(2 * n_pad * s * h * (4 * c1) + 2 * n_pad * s * (2 * c1) * 8)
    bytes_accessed = int(x.size * cdt.itemsize + weight_bytes + 2 * n_pad * s * 4)

    kernel = functools.partial(_dual_head_kernel, negative_slope=0.01)
    const2 = lambda b: (0, 0)

    out_head, out_tail = pl.pallas_call(
        kernel,
        out_shape=(
            jax.ShapeDtypeStruct((n_pad * s, 1), jnp.float32),
            jax.ShapeDtypeStruct((n_pad * s, 1), jnp.float32),
        ),
        grid=(n_tiles,),
        in_specs=[
            pl.BlockSpec((b_tile, s, h), lambda b: (b, 0, 0)),
            pl.BlockSpec(wt1.shape, const2),
            pl.BlockSpec(wt0.shape, const2),
            pl.BlockSpec(b1.shape, const2),
            pl.BlockSpec(v.shape, const2),
            pl.BlockSpec(beff.shape, const2),
        ],
        out_specs=(
            pl.BlockSpec((rows, 1), lambda b: (b, 0)),
            pl.BlockSpec((rows, 1), lambda b: (b, 0)),
        ),
        compiler_params=pltpu.CompilerParams(
            dimension_semantics=("parallel",),
            vmem_limit_bytes=vmem_limit,
        ),
        cost_estimate=pl.CostEstimate(
            flops=flops, transcendentals=0, bytes_accessed=bytes_accessed),
    )(x, wt1, wt0, b1, v, beff)

    # The (n_pad*S, 1) column and the (n_pad, S) row-major layouts are identical
    # in HBM; this reshape + slice of the tiny logits is effectively free in XLA.
    logits_head = out_head.reshape(n_pad, s)[:n]
    logits_tail = out_tail.reshape(n_pad, s)[:n]
    return logits_head, logits_tail


def _reference_forward(hidden_states, params):
    """Pure-JAX f32 reference (HIGHEST precision) mirroring the PyTorch head."""
    x = jnp.transpose(hidden_states, (0, 2, 1)).astype(jnp.float32)
    hi = jax.lax.Precision.HIGHEST

    def conv1d_same_k2(inp, w, b):
        out = jax.lax.conv_general_dilated(
            inp, w, window_strides=(1,), padding=[(1, 1)],
            dimension_numbers=("NCH", "OIH", "NCH"), precision=hi)
        out = out + b[None, :, None]
        return out[:, :, :-1]                       # cut_last_element (K=2, stride=1)

    def branch(w1, b1, w2, b2, wd, bd):
        f = conv1d_same_k2(x, w1, b1)
        f = jnp.where(f >= 0, f, 0.01 * f)          # LeakyReLU
        f = conv1d_same_k2(f, w2, b2)
        f = jnp.transpose(f, (0, 2, 1))             # (N, S, C2)
        return jnp.einsum("nsc,oc->nso", f, wd, precision=hi)[..., 0] + bd[0]

    logits_head = branch(params["conv_head_w"], params["conv_head_b"],
                         params["conv_head2_w"], params["conv_head2_b"],
                         params["dense_head_w"], params["dense_head_b"])
    logits_tail = branch(params["conv_tail_w"], params["conv_tail_b"],
                         params["conv_tail2_w"], params["conv_tail2_b"],
                         params["dense_tail_w"], params["dense_tail_b"])
    return logits_head, logits_tail


if __name__ == "__main__":
    # Small stand-in shapes: batch=3, seq=16, hidden=64 (real RoBERTa: hidden=768,
    # seq<=512).  Conv channel counts 128 -> 64 match the module exactly.
    # N=3 exercises batch padding (n_pad=4, b_tile=2) AND the in-tile batch
    # boundary masking of the sequence shift.
    N, S, H = 3, 16, 64
    C1, C2 = 128, 64

    key = jax.random.PRNGKey(0)
    ks = jax.random.split(key, 13)

    def uinit(k, shape, fan_in):
        bound = 1.0 / math.sqrt(fan_in)
        return jax.random.uniform(k, shape, jnp.float32, -bound, bound)

    hidden_states = jax.random.normal(ks[0], (N, S, H), jnp.float32)
    params = {
        "conv_head_w": uinit(ks[1], (C1, H, 2), H * 2),
        "conv_head_b": uinit(ks[2], (C1,), H * 2),
        "conv_tail_w": uinit(ks[3], (C1, H, 2), H * 2),
        "conv_tail_b": uinit(ks[4], (C1,), H * 2),
        "conv_head2_w": uinit(ks[5], (C2, C1, 2), C1 * 2),
        "conv_head2_b": uinit(ks[6], (C2,), C1 * 2),
        "conv_tail2_w": uinit(ks[7], (C2, C1, 2), C1 * 2),
        "conv_tail2_b": uinit(ks[8], (C2,), C1 * 2),
        "dense_head_w": uinit(ks[9], (1, C2), C2),
        "dense_head_b": uinit(ks[10], (1,), C2),
        "dense_tail_w": uinit(ks[11], (1, C2), C2),
        "dense_tail_b": uinit(ks[12], (1,), C2),
    }

    ref_head, ref_tail = _reference_forward(hidden_states, params)

    # float32 compute path (faithful to the PyTorch module's numerics).
    out_h32, out_t32 = roberta_dual_head_forward(
        hidden_states, params, compute_dtype=jnp.float32)
    jax.block_until_ready((out_h32, out_t32))
    assert out_h32.shape == (N, S) and out_t32.shape == (N, S)
    assert jnp.allclose(out_h32, ref_head, atol=1e-2, rtol=1e-2)
    assert jnp.allclose(out_t32, ref_tail, atol=1e-2, rtol=1e-2)

    # bf16 compute path (default): MXU-rate matmuls with f32 accumulation.
    out_hbf, out_tbf = roberta_dual_head_forward(
        hidden_states, params, compute_dtype=jnp.bfloat16)
    jax.block_until_ready((out_hbf, out_tbf))
    assert out_hbf.shape == (N, S) and out_tbf.shape == (N, S)
    assert jnp.allclose(out_hbf, ref_head, atol=5e-2, rtol=5e-2)
    assert jnp.allclose(out_tbf, ref_tail, atol=5e-2, rtol=5e-2)

    print("KERNEL_OK")
</pallas_src>

<mosaic_0001>
module attributes {stable_mosaic.version = 11 : i64} {
  func.func @_dual_head_kernel(%arg0: i32, %arg1: memref<2x16x64xf32, #tpu.memory_space<vmem>>, %arg2: memref<64x256xf32, #tpu.memory_space<vmem>>, %arg3: memref<64x256xf32, #tpu.memory_space<vmem>>, %arg4: memref<1x256xf32, #tpu.memory_space<vmem>>, %arg5: memref<256x8xf32, #tpu.memory_space<vmem>>, %arg6: memref<1x2xf32, #tpu.memory_space<vmem>>, %arg7: memref<32x1xf32, #tpu.memory_space<vmem>>, %arg8: memref<32x1xf32, #tpu.memory_space<vmem>>) attributes {dimension_semantics = [#tpu.dimension_semantics<parallel>], iteration_bounds = array<i64: 2>, scalar_prefetch = 0 : i64, scratch_operands = 0 : i64, tpu.core_type = #tpu.core_type<tc>, window_params = [{transform_indices = @transform_0, window_bounds = array<i64: 2, 16, 64>}, {pipeline_mode = #tpu.pipeline_mode<synchronous>, transform_indices = @transform_1, window_bounds = array<i64: 64, 256>}, {pipeline_mode = #tpu.pipeline_mode<synchronous>, transform_indices = @transform_2, window_bounds = array<i64: 64, 256>}, {pipeline_mode = #tpu.pipeline_mode<synchronous>, transform_indices = @transform_3, window_bounds = array<i64: 1, 256>}, {pipeline_mode = #tpu.pipeline_mode<synchronous>, transform_indices = @transform_4, window_bounds = array<i64: 256, 8>}, {pipeline_mode = #tpu.pipeline_mode<synchronous>, transform_indices = @transform_5, window_bounds = array<i64: 1, 2>}, {transform_indices = @transform_6, window_bounds = array<i64: 32, 1>}, {transform_indices = @transform_7, window_bounds = array<i64: 32, 1>}]} {
    %c0 = arith.constant 0 : index
    %c0_0 = arith.constant 0 : index
    %c0_1 = arith.constant 0 : index
    %0 = vector.load %arg1[%c0, %c0_0, %c0_1] : memref<2x16x64xf32, #tpu.memory_space<vmem>>, vector<2x16x64xf32>
    %1 = vector.shape_cast %0 : vector<2x16x64xf32> to vector<32x64xf32>
    %c0_2 = arith.constant 0 : index
    %c0_3 = arith.constant 0 : index
    %2 = vector.load %arg2[%c0_2, %c0_3] : memref<64x256xf32, #tpu.memory_space<vmem>>, vector<64x256xf32>
    %cst = arith.constant dense<0.000000e+00> : vector<32x256xf32>
    %3 = tpu.matmul %1, %2, %cst {dimension_numbers = #tpu.dot_dimension_numbers<[1], [0], [0], [1], [0, 0, 1, 1], [], []>} : vector<32x64xf32>, vector<64x256xf32>, vector<32x256xf32> -> vector<32x256xf32>
    %c0_4 = arith.constant 0 : index
    %c0_5 = arith.constant 0 : index
    %4 = vector.load %arg3[%c0_4, %c0_5] : memref<64x256xf32, #tpu.memory_space<vmem>>, vector<64x256xf32>
    %cst_6 = arith.constant dense<0.000000e+00> : vector<32x256xf32>
    %5 = tpu.matmul %1, %4, %cst_6 {dimension_numbers = #tpu.dot_dimension_numbers<[1], [0], [0], [1], [0, 0, 1, 1], [], []>} : vector<32x64xf32>, vector<64x256xf32>, vector<32x256xf32> -> vector<32x256xf32>
    %6 = tpu.iota {dimensions = array<i32: 0>} : vector<32x1xi32>
    %c16_i32 = arith.constant 16 : i32
    %c0_i32 = arith.constant 0 : i32
    %7 = arith.cmpi eq, %c16_i32, %c0_i32 : i32
    %c1_i32 = arith.constant 1 : i32
    %8 = arith.select %7, %c1_i32, %c16_i32 : i32
    %9 = vector.broadcast %8 : i32 to vector<32x1xi32>
    %10 = arith.remsi %6, %9 : vector<32x1xi32>
    %c0_i32_7 = arith.constant 0 : i32
    %11 = vector.broadcast %c0_i32_7 : i32 to vector<32x1xi32>
    %12 = arith.cmpi ne, %10, %11 : vector<32x1xi32>
    %c0_i32_8 = arith.constant 0 : i32
    %13 = vector.broadcast %c0_i32_8 : i32 to vector<32x1xi32>
    %14 = arith.cmpi slt, %10, %13 : vector<32x1xi32>
    %c0_i32_9 = arith.constant 0 : i32
    %15 = arith.cmpi slt, %8, %c0_i32_9 : i32
    %16 = vector.broadcast %15 : i1 to vector<32x1xi1>
    %17 = vector.broadcast %16 : vector<32x1xi1> to vector<32x1xi1>
    %18 = arith.xori %14, %17 : vector<32x1xi1>
    %19 = arith.andi %18, %12 : vector<32x1xi1>
    %20 = vector.broadcast %8 : i32 to vector<32x1xi32>
    %21 = arith.addi %10, %20 : vector<32x1xi32>
    %22 = arith.select %19, %21, %10 : vector<32x1xi1>, vector<32x1xi32>
    %c0_i32_10 = arith.constant 0 : i32
    %23 = vector.broadcast %c0_i32_10 : i32 to vector<32x1xi32>
    %24 = arith.cmpi ne, %22, %23 : vector<32x1xi32>
    %c1_i32_11 = arith.constant 1 : i32
    %25 = tpu.dynamic_rotate %5 by %c1_i32_11 dim 0 : vector<32x256xf32>, i32 -> vector<32x256xf32>
    %cst_12 = arith.constant 0.000000e+00 : f32
    %26 = vector.shape_cast %24 : vector<32x1xi1> to vector<32x1xi1>
    %27 = vector.broadcast %26 : vector<32x1xi1> to vector<32x256xi1>
    %28 = vector.broadcast %cst_12 : f32 to vector<32x256xf32>
    %29 = arith.select %27, %25, %28 : vector<32x256xi1>, vector<32x256xf32>
    %30 = arith.addf %3, %29 : vector<32x256xf32>
    %c0_13 = arith.constant 0 : index
    %c0_14 = arith.constant 0 : index
    %31 = vector.load %arg4[%c0_13, %c0_14] : memref<1x256xf32, #tpu.memory_space<vmem>>, vector<1x256xf32>
    %32 = vector.broadcast %31 : vector<1x256xf32> to vector<32x256xf32>
    %33 = arith.addf %30, %32 : vector<32x256xf32>
    %cst_15 = arith.constant 0.000000e+00 : f32
    %34 = vector.broadcast %cst_15 : f32 to vector<32x256xf32>
    %35 = arith.cmpf oge, %33, %34 : vector<32x256xf32>
    %cst_16 = arith.constant 0.00999999977 : f32
    %36 = vector.broadcast %cst_16 : f32 to vector<32x256xf32>
    %37 = arith.mulf %33, %36 : vector<32x256xf32>
    %38 = arith.select %35, %33, %37 : vector<32x256xi1>, vector<32x256xf32>
    %c0_17 = arith.constant 0 : index
    %c0_18 = arith.constant 0 : index
    %39 = vector.load %arg5[%c0_17, %c0_18] : memref<256x8xf32, #tpu.memory_space<vmem>>, vector<256x8xf32>
    %cst_19 = arith.constant dense<0.000000e+00> : vector<32x8xf32>
    %40 = tpu.matmul %38, %39, %cst_19 {dimension_numbers = #tpu.dot_dimension_numbers<[1], [0], [0], [1], [0, 0, 1, 1], [], []>} : vector<32x256xf32>, vector<256x8xf32>, vector<32x8xf32> -> vector<32x8xf32>
    %c1_i32_20 = arith.constant 1 : i32
    %41 = tpu.dynamic_rotate %40 by %c1_i32_20 dim 0 : vector<32x8xf32>, i32 -> vector<32x8xf32>
    %cst_21 = arith.constant 0.000000e+00 : f32
    %42 = vector.shape_cast %24 : vector<32x1xi1> to vector<32x1xi1>
    %43 = vector.broadcast %42 : vector<32x1xi1> to vector<32x8xi1>
    %44 = vector.broadcast %cst_21 : f32 to vector<32x8xf32>
    %45 = arith.select %43, %41, %44 : vector<32x8xi1>, vector<32x8xf32>
    %c0_22 = arith.constant 0 : index
    %c0_23 = arith.constant 0 : index
    %46 = vector.load %arg6[%c0_22, %c0_23] : memref<1x2xf32, #tpu.memory_space<vmem>>, vector<1x2xf32>
    %47 = vector.extract_strided_slice %40 {offsets = [0, 0], sizes = [32, 1], strides = [1, 1]} : vector<32x8xf32> to vector<32x1xf32>
    %48 = vector.extract_strided_slice %45 {offsets = [0, 1], sizes = [32, 1], strides = [1, 1]} : vector<32x8xf32> to vector<32x1xf32>
    %49 = arith.addf %47, %48 : vector<32x1xf32>
    %50 = vector.extract_strided_slice %46 {offsets = [0, 0], sizes = [1, 1], strides = [1, 1]} : vector<1x2xf32> to vector<1x1xf32>
    %51 = vector.broadcast %50 : vector<1x1xf32> to vector<32x1xf32>
    %52 = arith.addf %49, %51 : vector<32x1xf32>
    %c0_24 = arith.constant 0 : index
    %c0_25 = arith.constant 0 : index
    %53 = vector.load %arg7[%c0_24, %c0_25] : memref<32x1xf32, #tpu.memory_space<vmem>>, vector<32x1xf32>
    tpu.vector_store %arg7[%c0_24, %c0_25], %52 {strides = array<i32>} : memref<32x1xf32, #tpu.memory_space<vmem>>, vector<32x1xf32>,
    %54 = vector.extract_strided_slice %40 {offsets = [0, 2], sizes = [32, 1], strides = [1, 1]} : vector<32x8xf32> to vector<32x1xf32>
    %55 = vector.extract_strided_slice %45 {offsets = [0, 3], sizes = [32, 1], strides = [1, 1]} : vector<32x8xf32> to vector<32x1xf32>
    %56 = arith.addf %54, %55 : vector<32x1xf32>
    %57 = vector.extract_strided_slice %46 {offsets = [0, 1], sizes = [1, 1], strides = [1, 1]} : vector<1x2xf32> to vector<1x1xf32>
    %58 = vector.broadcast %57 : vector<1x1xf32> to vector<32x1xf32>
    %59 = arith.addf %56, %58 : vector<32x1xf32>
    %c0_26 = arith.constant 0 : index
    %c0_27 = arith.constant 0 : index
    %60 = vector.load %arg8[%c0_26, %c0_27] : memref<32x1xf32, #tpu.memory_space<vmem>>, vector<32x1xf32>
    tpu.vector_store %arg8[%c0_26, %c0_27], %59 {strides = array<i32>} : memref<32x1xf32, #tpu.memory_space<vmem>>, vector<32x1xf32>,
    return
  }
  func.func @transform_0(%arg0: i32) -> (i32, i32, i32) {
    %c0_i32 = arith.constant 0 : i32
    %c0_i32_0 = arith.constant 0 : i32
    %c0_i32_1 = arith.constant 0 : i32
    return %arg0, %c0_i32, %c0_i32_0 : i32, i32, i32
  }
  func.func @transform_1(%arg0: i32) -> (i32, i32) {
    %c0_i32 = arith.constant 0 : i32
    %c0_i32_0 = arith.constant 0 : i32
    %c0_i32_1 = arith.constant 0 : i32
    return %c0_i32, %c0_i32_0 : i32, i32
  }
  func.func @transform_2(%arg0: i32) -> (i32, i32) {
    %c0_i32 = arith.constant 0 : i32
    %c0_i32_0 = arith.constant 0 : i32
    %c0_i32_1 = arith.constant 0 : i32
    return %c0_i32, %c0_i32_0 : i32, i32
  }
  func.func @transform_3(%arg0: i32) -> (i32, i32) {
    %c0_i32 = arith.constant 0 : i32
    %c0_i32_0 = arith.constant 0 : i32
    %c0_i32_1 = arith.constant 0 : i32
    return %c0_i32, %c0_i32_0 : i32, i32
  }
  func.func @transform_4(%arg0: i32) -> (i32, i32) {
    %c0_i32 = arith.constant 0 : i32
    %c0_i32_0 = arith.constant 0 : i32
    %c0_i32_1 = arith.constant 0 : i32
    return %c0_i32, %c0_i32_0 : i32, i32
  }
  func.func @transform_5(%arg0: i32) -> (i32, i32) {
    %c0_i32 = arith.constant 0 : i32
    %c0_i32_0 = arith.constant 0 : i32
    %c0_i32_1 = arith.constant 0 : i32
    return %c0_i32, %c0_i32_0 : i32, i32
  }
  func.func @transform_6(%arg0: i32) -> (i32, i32) {
    %c0_i32 = arith.constant 0 : i32
    %c0_i32_0 = arith.constant 0 : i32
    return %arg0, %c0_i32 : i32, i32
  }
  func.func @transform_7(%arg0: i32) -> (i32, i32) {
    %c0_i32 = arith.constant 0 : i32
    %c0_i32_0 = arith.constant 0 : i32
    return %arg0, %c0_i32 : i32, i32
  }
}

</mosaic_0001>

<bundles_post_ra>
// kernel: tpu_custom_call.1
= control target key start
LH: loop header
LB: loop body
LE: loop exit
PB: predicated region body
PF: predicated region fallthrough
CT: control target
= control target key end

     0   :  { %13 = vsyncpa [#allocation3], 0  ;;  %s1470_s0 = inlined_call_operand.hbm [shape: f32[4,16,64], index: 0, kind: input, shape index: {}]   ;;  %s1471_s1 = inlined_call_operand.vmem [shape: f32[64,256], index: 1, kind: input, shape index: {}]   ;;  %s1472_s2 = inlined_call_operand.vmem [shape: f32[64,256], index: 2, kind: input, shape index: {}]   ;;  %s1473_s3 = inlined_call_operand.vmem [shape: f32[1,256], index: 3, kind: input, shape index: {}]   ;;  %s1474_s4 = inlined_call_operand.vmem [shape: f32[256,8], index: 4, kind: input, shape index: {}]   ;;  %s1475_s5 = inlined_call_operand.vmem [shape: f32[1,2], index: 5, kind: input, shape index: {}]   ;;  %s1476_s6 = inlined_call_operand.vmem [shape: f32[64,1], index: 6, kind: output, shape index: {0}]   ;;  %s1477_s7 = inlined_call_operand.vmem [shape: f32[64,1], index: 7, kind: output, shape index: {1}]  }
   0x1   :  { %15 = vsyncpa [#allocation3 + $0x1], 0  ;;  %s1096_s24 = smov 0   ;;  %s1098_s25 = smov 0  }
   0x2   :  { %s1100_s26 = smov 0   ;;  %s1102_s27 = smov 0  }
   0x3 LB: > { %s874_s28 = sadd.s32 4294967295, %s1049_s27   ;;  %s1116_s29 = sadd.s32 1, %s1049_s27   ;;  %s1049_s27 = sphi %s1102_s27, %s1488_s27   ;;  %s1045_s26 = sphi %s1100_s26, %s1487_s26   ;;  %s1041_s25 = sphi %s1098_s25, %s1486_s25   ;;  %s1037_s24 = sphi %s1096_s24, %s1485_s24  }
   0x4   : > { %s25_s30 = ssub.s32 %s1049_s27, %s1116_s29  ;;  %s28_s8 = sadd.s32 1, %s1045_s26 }
   0x5   : > { %p26_p0 = scmp.eq.s32.totalorder %s25_s30, 0  ;;  %p35_p1 = scmp.ne.s32.totalorder %s1045_s26, %s1041_s25 }
   0x6   : > { %p36_p2 = scmp.eq.s32.totalorder %s1049_s27, 0  ;;  %p41_p3 = scmp.ne.s32.totalorder %s1041_s25, %s1037_s24 }
   0x7   : > { %s1126_s9 = scalar_select %p26_p0, %s1045_s26, %s28_s8  }
   0x8   : > { %p1128_p4 = por %p36_p2, %p35_p1  ;;  %p42_p5 = scmp.eq.s32.totalorder %s874_s28, 0 }
   0x9   : > { %p946_p6 = scmp.lt.s32.totalorder %s1049_s27, 2  ;;  %s237_s12 = sand.u32 1, %s1045_s26  }
   0xa   : > { %p1135_p7 = por %p42_p5, %p41_p3  ;;  %s878_s13 = sshll.u32 %s237_s12, 5 }
   0xb   : > { %s907_s14 = sshll.u32 %s1049_s27, 5  ;;  %s241_s18 = scalar_lea.vmem [#allocation2], %s878_s13 }
   0xc   : > { %s247_s17 = scalar_lea.hbm %s1470_s0, %s907_s14  ;;  %s250_s19 = sshll.u32 %s241_s18, 4  ;;  %s251_s19 = int_to_ptr.vmem [resolvable:$true] %s250_s19 }
   0xd   : > { %s248_s20 = sshll.u32 %s247_s17, 4  ;;  %p1146_p8 = pnand %p946_p6, %p1128_p4  ;;  %s249_s20 = int_to_ptr.hbm [resolvable:$true] %s248_s20 }
   0xe   : > { %p882_p9 = scmp.ge.s32.totalorder %s1049_s27, 1  ;;  %s238_s22 = scalar_lea.sflag [#allocation3], %s237_s12 }
   0xf   : > { %s985_s23 = sshra.s32 %s249_s20, 4  ;;  %p989_p11 = pneg %p1146_p8  ;;  %s986_s23 = int_to_ptr.hbm [resolvable:$true] %s985_s23 }
  0x10   : > { %s987_s24 = scalar_lea.hbm %s986_s23, 32  ;;  %s992_s13 = scalar_lea.hbm %s1470_s0, 64 }
  0x11   : > { %p988_p10 = scmp.ne.s32.totalorder %s986_s23, %s987_s24  ;;  %p993_p0 = scmp.lt.s32.totalorder %s986_s23, %s1470_s0 }
  0x12   : > { %p994_p1 = scmp.lt.s32.totalorder %s992_s13, %s987_s24 }
  0x13   : > { %p990_p12 = pnand %p989_p11, %p988_p10 }
  0x14   : > { %p995_p2 = por %p994_p1, %p993_p0 }
  0x15   : > { %p991_p13 = pneg %p990_p12 }
  0x17   : > { %p996_p3 = pnand %p995_p2, %p991_p13 }
  0x19   : > { %999 = shalt.err (!%p996_p3)
}
  0x1a   : > { %s1051_s12 = smov 128   ;;  %s1052_s15 = smov 8  }
  0x1b   : > { %945 = dma.hbm_to_vmem [thread:$0]  (!%p1146_p8), %s249_s20, 512, %s251_s19, %s238_s22, %s1051_s12, %s1051_s12, %s1052_s15  }
  0x1c   : > { %p258_p4 = scmp.lt.s32.totalorder %s1049_s27, 3 }
  0x1e   : > { %p259_p5 = pnand %p882_p9, %p258_p4 }
  0x1f   : > { %s264_s16 = sand.u32 (!%p259_p5), 1, %s1041_s25  }
  0x20   : > { %262 = sbr.rel (%p259_p5) target bundleno = 601 (0x259), region = 44  ;;  %s883_s17 = sshll.u32 (!%p259_p5), %s264_s16, 5 }
  0x21   : > { %s265_s18 = scalar_lea.sflag (!%p259_p5), [#allocation3], %s264_s16  ;;  %s1165_s23 = scalar_lea.vmem (!%p259_p5), [#allocation2], %s883_s17 }
  0x25   : > { %1032 = dma.done.wait (%p1135_p7), %s265_s18, 512  }
  0x26   : > { %1034 = vsyncadd (%p1135_p7), %s265_s18, 4294966784  ;;  %v352_v0 = vld [vmem:[%s1472_s2 + $0x70] sm:$0xff]  ;;  %v353_v1 = vld [vmem:[%s1472_s2 + $0x78] sm:$0xff]  ;;  %vm354_vm0 = vcmask 523264   ;;  %s1053_s17 = smov 127   ;;  %s1054_s30 = smov 1  }
  0x27   : > { %v336_v2 = vld [vmem:[%s1471_s1 + $0x70] sm:$0xff]  ;;  %375 = vmatpush.msra.mxu0 %v352_v0  ;;  %404 = vmatpush.msra.mxu1 %v353_v1  ;;  %v337_v3 = vld [vmem:[%s1471_s1 + $0x78] sm:$0xff]  ;;  %v350_v4 = vld [vmem:[%s1472_s2 + $0x60] sm:$0xff]  ;;  %s884_s19 = sshll.u32 %s874_s28, 2  ;;  %vm741_vm12 = vcmask 7168   ;;  %s1055_s27 = smov 126  }
  0x28   : > { %v351_v5 = vld [vmem:[%s1472_s2 + $0x68] sm:$0xff]  ;;  %523 = vmatpush.msra.mxu2 %v336_v2  ;;  %552 = vmatpush.msra.mxu3 %v337_v3  ;;  %v334_v6 = vld [vmem:[%s1471_s1 + $0x60] sm:$0xff]  ;;  %v348_v8 = vld [vmem:[%s1472_s2 + $0x50] sm:$0xff]  ;;  %p307_p6 = scmp.lt.s32.totalorder %s884_s19, 7 }
  0x29   : > { %v335_v7 = vld [vmem:[%s1471_s1 + $0x68] sm:$0xff]  ;;  %376 = vmatpush.msra.mxu0 %v350_v4  ;;  %405 = vmatpush.msra.mxu1 %v351_v5  ;;  %v349_v9 = vld [vmem:[%s1472_s2 + $0x58] sm:$0xff]  ;;  %v332_v10 = vld [vmem:[%s1471_s1 + $0x50] sm:$0xff] }
  0x2a   : > { %v333_v11 = vld [vmem:[%s1471_s1 + $0x58] sm:$0xff]  ;;  %524 = vmatpush.msra.mxu2 %v334_v6  ;;  %553 = vmatpush.msra.mxu3 %v335_v7  ;;  %v346_v12 = vld [vmem:[%s1472_s2 + $0x40] sm:$0xff]  ;;  %v347_v13 = vld [vmem:[%s1472_s2 + $0x48] sm:$0xff]  ;;  %v425_v6 = vlaneseq  ;;  %s1490_s19 = smov (!%p307_p6, %s884_s19), 7 }
  0x2b   : > { %377 = vmatpush.msra.mxu0 %v348_v8  ;;  %406 = vmatpush.msra.mxu1 %v349_v9  ;;  %v330_v14 = vld [vmem:[%s1471_s1 + $0x40] sm:$0xff]  ;;  %v331_v15 = vld [vmem:[%s1471_s1 + $0x48] sm:$0xff]  ;;  %v344_v16 = vld [vmem:[%s1472_s2 + $0x30] sm:$0xff]  ;;  %s885_s20 = sshll.u32 %s1490_s19, 3 }
  0x2c   : > { %525 = vmatpush.msra.mxu2 %v332_v10  ;;  %554 = vmatpush.msra.mxu3 %v333_v11  ;;  %v345_v17 = vld [vmem:[%s1472_s2 + $0x38] sm:$0xff]  ;;  %v328_v18 = vld [vmem:[%s1471_s1 + $0x30] sm:$0xff]  ;;  %v342_v20 = vld [vmem:[%s1472_s2 + $0x20] sm:$0xff]  ;;  %v1383_v11 = vshrl.u32 %v425_v6, 7  ;;  %s310_s8 = scalar_lea.vmem %s1476_s6, %s885_s20  ;;  %s316_s11 = scalar_lea.vmem %s1477_s7, %s885_s20 }
  0x2d   : > { %378 = vmatpush.msra.mxu0 %v346_v12  ;;  %407 = vmatpush.msra.mxu1 %v347_v13  ;;  %v329_v19 = vld [vmem:[%s1471_s1 + $0x38] sm:$0xff]  ;;  %v343_v21 = vld [vmem:[%s1472_s2 + $0x28] sm:$0xff]  ;;  %v326_v22 = vld [vmem:[%s1471_s1 + $0x20] sm:$0xff] }
  0x2e   : > { %526 = vmatpush.msra.mxu2 %v330_v14  ;;  %555 = vmatpush.msra.mxu3 %v331_v15  ;;  %v327_v23 = vld [vmem:[%s1471_s1 + $0x28] sm:$0xff]  ;;  %v340_v24 = vld [vmem:[%s1472_s2 + $0x10] sm:$0xff]  ;;  %v341_v25 = vld [vmem:[%s1472_s2 + $0x18] sm:$0xff]  ;;  %v428_v12 = vadd.s32 16, %v1383_v11  ;;  %vm490_vm1 = vcmp.lt.s32.totalorder %v1383_v11, 1 }
  0x2f   : > { %379 = vmatpush.msra.mxu0 %v344_v16  ;;  %408 = vmatpush.msra.mxu1 %v345_v17  ;;  %v324_v26 = vld [vmem:[%s1471_s1 + $0x10] sm:$0xff]  ;;  %v325_v27 = vld [vmem:[%s1471_s1 + $0x18] sm:$0xff]  ;;  %v338_v28 = vld [vmem:[%s1472_s2] sm:$0xff] }
  0x30   : > { %527 = vmatpush.msra.mxu2 %v328_v18  ;;  %556 = vmatpush.msra.mxu3 %v329_v19  ;;  %v339_v29 = vld [vmem:[%s1472_s2 + $0x8] sm:$0xff]  ;;  %v322_v30 = vld [vmem:[%s1471_s1] sm:$0xff]  ;;  %v626_v33 = vld [vmem:[%s1474_s4 + $0x78] sm:$0xff]  ;;  %v448_v17 = vand.u32 15, %v428_v12 }
  0x31   : > { %380 = vmatpush.msra.mxu0 %v342_v20  ;;  %409 = vmatpush.msra.mxu1 %v343_v21  ;;  %v323_v31 = vld [vmem:[%s1471_s1 + $0x8] sm:$0xff]  ;;  %v318_v32 = vld [vmem:[%s1165_s23] sm:$0xff]  ;;  %v642_v34 = vld [vmem:[%s1474_s4 + $0xf8] sm:$0xff] }
  0x32   : > { %528 = vmatpush.msra.mxu2 %v326_v22  ;;  %557 = vmatpush.msra.mxu3 %v327_v23  ;;  %v319_v35 = vld [vmem:[%s1165_s23 + $0x8] sm:$0xff]  ;;  %v320_v36 = vld [vmem:[%s1165_s23 + $0x10] sm:$0xff]  ;;  %v321_v37 = vld [vmem:[%s1165_s23 + $0x18] sm:$0xff]  ;;  %vm1390_vm2 = vcmp.ne.s32.totalorder %v448_v17, 0 }
  0x33   : > { %381 = vmatpush.msra.mxu0 %v340_v24  ;;  %410 = vmatpush.msra.mxu1 %v341_v25  ;;  %v625_v38 = vld [vmem:[%s1474_s4 + $0x70] sm:$0xff]  ;;  %v624_v40 = vld [vmem:[%s1474_s4 + $0x68] sm:$0xff]  ;;  %v623_v42 = vld [vmem:[%s1474_s4 + $0x60] sm:$0xff] }
  0x34   : > { %529 = vmatpush.msra.mxu2 %v324_v26  ;;  %558 = vmatpush.msra.mxu3 %v325_v27  ;;  %v641_v39 = vld [vmem:[%s1474_s4 + $0xf0] sm:$0xff]  ;;  %v640_v41 = vld [vmem:[%s1474_s4 + $0xe8] sm:$0xff]  ;;  %v639_v43 = vld [vmem:[%s1474_s4 + $0xe0] sm:$0xff]  ;;  %v434_v26 = vand.u32 15, %v1383_v11 }
  0x35   : > { %382 = vmatpush.msra.mxu0 %v338_v28  ;;  %411 = vmatpush.msra.mxu1 %v339_v29  ;;  %v622_v44 = vld [vmem:[%s1474_s4 + $0x58] sm:$0xff]  ;;  %v621_v46 = vld [vmem:[%s1474_s4 + $0x50] sm:$0xff]  ;;  %v620_v48 = vld [vmem:[%s1474_s4 + $0x48] sm:$0xff] }
  0x36   : > { %530 = vmatpush.msra.mxu2 %v322_v30  ;;  %559 = vmatpush.msra.mxu3 %v323_v31  ;;  %v638_v45 = vld [vmem:[%s1474_s4 + $0xd8] sm:$0xff]  ;;  %v637_v47 = vld [vmem:[%s1474_s4 + $0xd0] sm:$0xff]  ;;  %v636_v49 = vld [vmem:[%s1474_s4 + $0xc8] sm:$0xff]  ;;  %vm1403_vm3 = vcmp.ne.s32.totalorder %v434_v26, 0 }
  0x37   : > { %888 = vmatmul.msk.f32.vlgmr.msra.gmra.mxu0 %vm354_vm0, %v318_v32  ;;  %892 = vmatmul.msk.f32.vlgmr.msra.gmra.mxu1 %vm354_vm0, %v318_v32  ;;  %v619_v50 = vld [vmem:[%s1474_s4 + $0x40] sm:$0xff]  ;;  %v618_v52 = vld [vmem:[%s1474_s4 + $0x38] sm:$0xff]  ;;  %v617_v54 = vld [vmem:[%s1474_s4 + $0x30] sm:$0xff] }
  0x38   : > { %896 = vmatmul.msk.f32.vlgmr.msra.gmra.mxu2 %vm354_vm0, %v318_v32  ;;  %900 = vmatmul.msk.f32.vlgmr.msra.gmra.mxu3 %vm354_vm0, %v318_v32  ;;  %v635_v51 = vld [vmem:[%s1474_s4 + $0xc0] sm:$0xff]  ;;  %v634_v53 = vld [vmem:[%s1474_s4 + $0xb8] sm:$0xff]  ;;  %v633_v55 = vld [vmem:[%s1474_s4 + $0xb0] sm:$0xff] }
  0x39   : > { %908 = vmatpush.msrb.mxu2 %v626_v33  ;;  %924 = vmatpush.msrb.mxu3 %v642_v34  ;;  %v616_v56 = vld [vmem:[%s1474_s4 + $0x28] sm:$0xff]  ;;  %v615_v58 = vld [vmem:[%s1474_s4 + $0x20] sm:$0xff]  ;;  %v614_v60 = vld [vmem:[%s1474_s4 + $0x18] sm:$0xff] }
  0x3a   : > { %643 = vmatpush.msrb.mxu0 %v626_v33  ;;  %672 = vmatpush.msrb.mxu1 %v642_v34  ;;  %v632_v57 = vld [vmem:[%s1474_s4 + $0xa8] sm:$0xff]  ;;  %v631_v59 = vld [vmem:[%s1474_s4 + $0xa0] sm:$0xff]  ;;  %v630_v61 = vld [vmem:[%s1474_s4 + $0x98] sm:$0xff] }
  0x3b   : > { %909 = vmatpush.msrb.mxu2 %v625_v38  ;;  %925 = vmatpush.msrb.mxu3 %v641_v39  ;;  %v613_v62 = vld [vmem:[%s1474_s4 + $0x10] sm:$0xff]  ;;  %v612_v0 = vld [vmem:[%s1474_s4 + $0x8] sm:$0xff]  ;;  %v611_v2 = vld [vmem:[%s1474_s4] sm:$0xff] }
  0x3c   : > { %644 = vmatpush.msrb.mxu0 %v625_v38  ;;  %673 = vmatpush.msrb.mxu1 %v641_v39  ;;  %v629_v63 = vld [vmem:[%s1474_s4 + $0x90] sm:$0xff]  ;;  %v628_v1 = vld [vmem:[%s1474_s4 + $0x88] sm:$0xff]  ;;  %v627_v3 = vld [vmem:[%s1474_s4 + $0x80] sm:$0xff] }
  0x3d   : > { %910 = vmatpush.msrb.mxu2 %v624_v40  ;;  %926 = vmatpush.msrb.mxu3 %v640_v41  ;;  %v573_v22 = vld [vmem:[%s1473_s3] sm:$0x3] }
  0x3e   : > { %645 = vmatpush.msrb.mxu0 %v624_v40  ;;  %674 = vmatpush.msrb.mxu1 %v640_v41  ;;  %v575_v27 = vperm.slane %v573_v22, 0  ;;  %v576_v32 = vperm.slane %v573_v22, 1 }
  0x3f   : > { %889 = vmatmul.msk.f32.gmra.mxu0 %vm354_vm0, %v319_v35  ;;  %893 = vmatmul.msk.f32.gmra.mxu1 %vm354_vm0, %v319_v35 }
  0x40   : > { %897 = vmatmul.msk.f32.gmra.mxu2 %vm354_vm0, %v319_v35  ;;  %901 = vmatmul.msk.f32.gmra.mxu3 %vm354_vm0, %v319_v35 }
  0x41   : > { %911 = vmatpush.msrb.mxu2 %v623_v42  ;;  %927 = vmatpush.msrb.mxu3 %v639_v43 }
  0x42   : > { %646 = vmatpush.msrb.mxu0 %v623_v42  ;;  %675 = vmatpush.msrb.mxu1 %v639_v43 }
  0x43   : > { %912 = vmatpush.msrb.mxu2 %v622_v44  ;;  %928 = vmatpush.msrb.mxu3 %v638_v45 }
  0x44   : > { %647 = vmatpush.msrb.mxu0 %v622_v44  ;;  %676 = vmatpush.msrb.mxu1 %v638_v45 }
  0x45   : > { %913 = vmatpush.msrb.mxu2 %v621_v46  ;;  %929 = vmatpush.msrb.mxu3 %v637_v47 }
  0x46   : > { %648 = vmatpush.msrb.mxu0 %v621_v46  ;;  %677 = vmatpush.msrb.mxu1 %v637_v47 }
  0x47   : > { %890 = vmatmul.msk.f32.gmra.mxu0 %vm354_vm0, %v320_v36  ;;  %894 = vmatmul.msk.f32.gmra.mxu1 %vm354_vm0, %v320_v36 }
  0x48   : > { %898 = vmatmul.msk.f32.gmra.mxu2 %vm354_vm0, %v320_v36  ;;  %902 = vmatmul.msk.f32.gmra.mxu3 %vm354_vm0, %v320_v36 }
  0x49   : > { %914 = vmatpush.msrb.mxu2 %v620_v48  ;;  %930 = vmatpush.msrb.mxu3 %v636_v49 }
  0x4a   : > { %649 = vmatpush.msrb.mxu0 %v620_v48  ;;  %678 = vmatpush.msrb.mxu1 %v636_v49 }
  0x4b   : > { %915 = vmatpush.msrb.mxu2 %v619_v50  ;;  %931 = vmatpush.msrb.mxu3 %v635_v51 }
  0x4c   : > { %650 = vmatpush.msrb.mxu0 %v619_v50  ;;  %679 = vmatpush.msrb.mxu1 %v635_v51 }
  0x4d   : > { %916 = vmatpush.msrb.mxu2 %v618_v52  ;;  %932 = vmatpush.msrb.mxu3 %v634_v53 }
  0x4e   : > { %651 = vmatpush.msrb.mxu0 %v618_v52  ;;  %680 = vmatpush.msrb.mxu1 %v634_v53 }
  0x4f   : > { %891 = vmatmul.msk.f32.gmra.mxu0 %vm354_vm0, %v321_v37  ;;  %895 = vmatmul.msk.f32.gmra.mxu1 %vm354_vm0, %v321_v37 }
  0x50   : > { %899 = vmatmul.msk.f32.gmra.mxu2 %vm354_vm0, %v321_v37  ;;  %903 = vmatmul.msk.f32.gmra.mxu3 %vm354_vm0, %v321_v37 }
  0x51   : > { %917 = vmatpush.msrb.mxu2 %v617_v54  ;;  %933 = vmatpush.msrb.mxu3 %v633_v55 }
  0x52   : > { %652 = vmatpush.msrb.mxu0 %v617_v54  ;;  %681 = vmatpush.msrb.mxu1 %v633_v55 }
  0x53   : > { %918 = vmatpush.msrb.mxu2 %v616_v56  ;;  %934 = vmatpush.msrb.mxu3 %v632_v57 }
  0x54   : > { %653 = vmatpush.msrb.mxu0 %v616_v56  ;;  %682 = vmatpush.msrb.mxu1 %v632_v57 }
  0x55   : > { %919 = vmatpush.msrb.mxu2 %v615_v58  ;;  %935 = vmatpush.msrb.mxu3 %v631_v59 }
  0x56   : > { %654 = vmatpush.msrb.mxu0 %v615_v58  ;;  %683 = vmatpush.msrb.mxu1 %v631_v59 }
  0x57   : > { %920 = vmatpush.msrb.mxu2 %v614_v60  ;;  %936 = vmatpush.msrb.mxu3 %v630_v61 }
  0x58   : > { %655 = vmatpush.msrb.mxu0 %v614_v60  ;;  %684 = vmatpush.msrb.mxu1 %v630_v61 }
  0x59   : > { %921 = vmatpush.msrb.mxu2 %v613_v62  ;;  %937 = vmatpush.msrb.mxu3 %v629_v63 }
  0x5a   : > { %656 = vmatpush.msrb.mxu0 %v613_v62  ;;  %685 = vmatpush.msrb.mxu1 %v629_v63 }
  0x5b   : > { %922 = vmatpush.msrb.mxu2 %v612_v0  ;;  %938 = vmatpush.msrb.mxu3 %v628_v1 }
  0x5c   : > { %657 = vmatpush.msrb.mxu0 %v612_v0  ;;  %686 = vmatpush.msrb.mxu1 %v628_v1 }
  0x5d   : > { %923 = vmatpush.msrb.mxu2 %v611_v2  ;;  %939 = vmatpush.msrb.mxu3 %v627_v3 }
  0x5e   : > { %658 = vmatpush.msrb.mxu0 %v611_v2  ;;  %687 = vmatpush.msrb.mxu1 %v627_v3 }
  0xb4   : > { %v384_v4 = vpop.f32.mrf.mxu0  ;;  %v413_v5 = vpop.f32.mrf.mxu1 }
  0xb5   : > { %v482_v38 = vrot.slane %v384_v4, 7  ;;  %v483_v39 = vrot.slane %v413_v5, 7 }
  0xbb   : > { %v532_v7 = vpop.f32.mrf.mxu2  ;;  %v561_v8 = vpop.f32.mrf.mxu3 }
  0xbc   : > { %v387_v9 = vpop.f32.mrf.mxu0  ;;  %v416_v10 = vpop.f32.mrf.mxu1 }
  0xbd   : > { %v484_v20 = vrot.slane %v387_v9, 7  ;;  %v485_v21 = vrot.slane %v416_v10, 7 }
  0xbf   : > { %v495_v44 = vsel %vm490_vm1, %v482_v38, %v484_v20  ;;  %v496_v45 = vsel %vm490_vm1, %v483_v39, %v485_v21 }
  0xc3   : > { %v535_v13 = vpop.f32.mrf.mxu2  ;;  %v564_v14 = vpop.f32.mrf.mxu3 }
  0xc4   : > { %v390_v15 = vpop.f32.mrf.mxu0  ;;  %v419_v16 = vpop.f32.mrf.mxu1  ;;  %v536_v54 = vadd.f32 %v535_v13, %v495_v44  ;;  %v565_v55 = vadd.f32 %v564_v14, %v496_v45 }
  0xc5   : > { %v486_v18 = vrot.slane %v390_v15, 7  ;;  %v487_v19 = vrot.slane %v419_v16, 7 }
  0xc6   : > { %v581_v6 = vadd.f32 %v575_v27, %v536_v54 }
  0xc7   : > { %v493_v24 = vsel %vm490_vm1, %v484_v20, %v486_v18  ;;  %v494_v25 = vsel %vm490_vm1, %v485_v21, %v487_v19 }
  0xc8   : > { %v511_v28 = vsel %vm1390_vm2, %v493_v24, 0.0  ;;  %v512_v30 = vsel %vm1390_vm2, %v494_v25, 0.0  ;;  %v597_v15 = vmul.f32 0.01, %v581_v6  ;;  %vm589_vm10 = vcmp.ge.f32.partialorder %v581_v6, 0.0 }
  0xca   : > { %v605_v17 = vsel %vm589_vm10, %v581_v6, %v597_v15 }
  0xcb   : > { %v538_v29 = vpop.f32.mrf.mxu2  ;;  %v567_v31 = vpop.f32.mrf.mxu3 }
  0xcc   : > { %v539_v33 = vadd.f32 %v538_v29, %v511_v28  ;;  %v568_v34 = vadd.f32 %v567_v31, %v512_v30  ;;  %v393_v35 = vpop.f32.mrf.mxu0  ;;  %v422_v37 = vpop.f32.mrf.mxu1 }
  0xcd   : > { %v488_v40 = vrot.slane %v393_v35, 7  ;;  %v489_v41 = vrot.slane %v422_v37, 7 }
  0xce   : > { %v583_v42 = vadd.f32 %v575_v27, %v539_v33  ;;  %v584_v43 = vadd.f32 %v576_v32, %v568_v34 }
  0xcf   : > { %v497_v46 = vsel %vm490_vm1, %v488_v40, %v482_v38  ;;  %v498_v47 = vsel %vm490_vm1, %v489_v41, %v483_v39  ;;  %v491_v56 = vsel %vm490_vm1, %v486_v18, %v488_v40  ;;  %v492_v59 = vsel %vm490_vm1, %v487_v19, %v489_v41 }
  0xd0   : > { %v507_v48 = vsel %vm1403_vm3, %v497_v46, 0.0  ;;  %v508_v49 = vsel %vm1403_vm3, %v498_v47, 0.0  ;;  %vm591_vm4 = vcmp.ge.f32.partialorder %v583_v42, 0.0  ;;  %v599_v50 = vmul.f32 0.01, %v583_v42 }
  0xd1   : > { %v533_v51 = vadd.f32 %v532_v7, %v507_v48  ;;  %v562_v52 = vadd.f32 %v561_v8, %v508_v49  ;;  %vm592_vm5 = vcmp.ge.f32.partialorder %v584_v43, 0.0  ;;  %v600_v53 = vmul.f32 0.01, %v584_v43 }
  0xd2   : > { %v607_v57 = vsel %vm591_vm4, %v583_v42, %v599_v50  ;;  %v582_v7 = vadd.f32 %v576_v32, %v565_v55  ;;  %v984_v42 = vld [vmem:[%s1475_s5] ss:$0 sm:$0xff] }
  0xd3   : > { %v541_v58 = vpop.f32.mrf.mxu2  ;;  %v570_v60 = vpop.f32.mrf.mxu3  ;;  %665 = vmatmul.f32.vlgmr.msrb.gmra.mxu2 %v607_v57  ;;  %v608_v61 = vsel %vm592_vm5, %v584_v43, %v600_v53  ;;  %v579_v62 = vadd.f32 %v575_v27, %v533_v51  ;;  %v580_v63 = vadd.f32 %v576_v32, %v562_v52 }
  0xd4   : > { %v542_v0 = vadd.f32 %v541_v58, %v491_v56  ;;  %v571_v1 = vadd.f32 %v570_v60, %v492_v59  ;;  %694 = vmatmul.f32.vlgmr.msrb.gmra.mxu3 %v608_v61  ;;  %v598_v16 = vmul.f32 0.01, %v582_v7  ;;  %vm590_vm11 = vcmp.ge.f32.partialorder %v582_v7, 0.0 }
  0xd5   : > { %vm587_vm6 = vcmp.ge.f32.partialorder %v579_v62, 0.0  ;;  %v595_v2 = vmul.f32 0.01, %v579_v62  ;;  %vm588_vm7 = vcmp.ge.f32.partialorder %v580_v63, 0.0  ;;  %v596_v3 = vmul.f32 0.01, %v580_v63 }
  0xd6   : > { %v585_v4 = vadd.f32 %v575_v27, %v542_v0  ;;  %v586_v5 = vadd.f32 %v576_v32, %v571_v1  ;;  %v606_v18 = vsel %vm590_vm11, %v582_v7, %v598_v16 }
  0xd7   : > { %v603_v8 = vsel %vm587_vm6, %v579_v62, %v595_v2  ;;  %v604_v9 = vsel %vm588_vm7, %v580_v63, %v596_v3 }
  0xd8   : > { %659 = vmatmul.f32.vlgmr.msrb.gmra.mxu0 %v603_v8  ;;  %688 = vmatmul.f32.vlgmr.msrb.gmra.mxu1 %v604_v9  ;;  %vm593_vm8 = vcmp.ge.f32.partialorder %v585_v4, 0.0  ;;  %v601_v10 = vmul.f32 0.01, %v585_v4  ;;  %vm594_vm9 = vcmp.ge.f32.partialorder %v586_v5, 0.0  ;;  %v602_v12 = vmul.f32 0.01, %v586_v5 }
  0xda   : > { %v609_v13 = vsel %vm593_vm8, %v585_v4, %v601_v10  ;;  %v610_v14 = vsel %vm594_vm9, %v586_v5, %v602_v12 }
  0xdb   : > { %668 = vmatmul.f32.gmra.mxu2 %v609_v13 }
  0xdc   : > { %697 = vmatmul.f32.gmra.mxu3 %v610_v14 }
  0xe0   : > { %662 = vmatmul.f32.gmra.mxu0 %v605_v17  ;;  %691 = vmatmul.f32.gmra.mxu1 %v606_v18 }
 0x155   : > { %v660_v19 = vpop.f32.mrf.mxu0  ;;  %v689_v20 = vpop.f32.mrf.mxu1 }
 0x156   : > { %v666_v21 = vpop.f32.mrf.mxu2  ;;  %v690_v27 = vadd.f32 %v689_v20, %v660_v19 }
 0x157   : > { %v695_v22 = vpop.f32.mrf.mxu3 }
 0x158   : > { %v696_v24 = vadd.f32 %v695_v22, %v666_v21  ;;  %v701_v34 = vrot.slane %v690_v27, 7 }
 0x15a   : > { %v703_v31 = vrot.slane %v696_v24, 7 }
 0x15d   : > { %v663_v25 = vpop.f32.mrf.mxu0  ;;  %v692_v26 = vpop.f32.mrf.mxu1 }
 0x15e   : > { %v669_v28 = vpop.f32.mrf.mxu2  ;;  %v693_v29 = vadd.f32 %v692_v26, %v663_v25 }
 0x15f   : > { %v698_v30 = vpop.f32.mrf.mxu3 }
 0x160   : > { %v702_v32 = vrot.slane %v693_v29, 7  ;;  %v699_v33 = vadd.f32 %v698_v30, %v669_v28 }
 0x162   : > { %v704_v35 = vrot.slane %v699_v33, 7  ;;  %v706_v37 = vsel %vm490_vm1, %v702_v32, %v703_v31  ;;  %v707_v23 = vsel %vm490_vm1, %v701_v34, %v702_v32 }
 0x163   : > { %v711_v38 = vsel %vm1390_vm2, %v706_v37, 0.0 }
 0x164   : > { %v705_v39 = vsel %vm490_vm1, %v703_v31, %v704_v35  ;;  %722 = vrot.lane.b32.xlu1 %v711_v38, %s1053_s17  ;;  %v708_v40 = vsel %vm490_vm1, %v704_v35, %v701_v34 }
 0x165   : > { %724 = vrot.lane.b32.xlu2 %v705_v39, %s1053_s17  ;;  %v709_v41 = vsel %vm1403_vm3, %v708_v40, 0.0 }
 0x166   : > { %718 = vrot.lane.b32.xlu0 %v709_v41, %s1053_s17 }
 0x16c   : > { %746 = vrot.lane.b32.xlu1 %v984_v42, %s1054_s30 }
 0x16e   : > { %720 = vrot.lane.b32.xlu0 %v707_v23, %s1053_s17 }
 0x1bf   : > { %v725_v11 = vpop.permute.xlu2 %724 }
 0x1c0   : > { %v733_v51 = vadd.f32 %v725_v11, %v699_v33 }
 0x1c2   : > { %v740_v56 = vadd.f32 %v984_v42, %v733_v51 }
 0x1c4   : > { %745 = vst.msk [vmem:[%s310_s8 + $0x18] sm:$0xff] %vm741_vm12, %v740_v56 }
 0x1d6   : > { %v723_v43 = vpop.permute.xlu1 %722 }
 0x1d7   : > { %v732_v46 = vadd.f32 %v723_v43, %v696_v24 }
 0x1d8   : > { %v719_v36 = vpop.permute.xlu0 %718 }
 0x1d9   : > { %v730_v44 = vadd.f32 %v719_v36, %v690_v27  ;;  %v739_v55 = vadd.f32 %v984_v42, %v732_v46 }
 0x1db   : > { %v737_v45 = vadd.f32 %v984_v42, %v730_v44  ;;  %744 = vst.msk [vmem:[%s310_s8 + $0x10] sm:$0xff] %vm741_vm12, %v739_v55 }
 0x1dd   : > { %742 = vst.msk [vmem:[%s310_s8] sm:$0xff] %vm741_vm12, %v737_v45 }
 0x1de   : > { %v747_v47 = vpop.permute.xlu1 %746 }
 0x1df   : > { %v751_v48 = vadd.f32 %v747_v47, %v732_v46  ;;  %v749_v49 = vadd.f32 %v747_v47, %v730_v44  ;;  %v752_v57 = vadd.f32 %v747_v47, %v733_v51 }
 0x1e0   : > { %v721_v50 = vpop.permute.xlu0 %720 }
 0x1e1   : > { %v731_v52 = vadd.f32 %v721_v50, %v693_v29  ;;  %761 = vrot.lane.b32.xlu1 %v751_v48, %s1055_s27  ;;  %757 = vrot.lane.b32.xlu2 %v749_v49, %s1055_s27 }
 0x1e3   : > { %v738_v53 = vadd.f32 %v984_v42, %v731_v52  ;;  %v750_v54 = vadd.f32 %v747_v47, %v731_v52 }
 0x1e5   : > { %759 = vrot.lane.b32.xlu0 %v750_v54, %s1055_s27  ;;  %743 = vst.msk [vmem:[%s310_s8 + $0x8] sm:$0xff] %vm741_vm12, %v738_v53 }
 0x1e9   : > { %763 = vrot.lane.b32.xlu2 %v752_v57, %s1055_s27 }
 0x23b   : > { %v758_v58 = vpop.permute.xlu2 %757 }
 0x23c   : > { %769 = vst.msk [vmem:[%s316_s11] sm:$0xff] %vm741_vm12, %v758_v58 }
 0x243   : > { %v764_v61 = vpop.permute.xlu2 %763 }
 0x244   : > { %772 = vst.msk [vmem:[%s316_s11 + $0x18] sm:$0xff] %vm741_vm12, %v764_v61 }
 0x253   : > { %v762_v60 = vpop.permute.xlu1 %761 }
 0x254   : > { %771 = vst.msk [vmem:[%s316_s11 + $0x10] sm:$0xff] %vm741_vm12, %v762_v60 }
 0x257   : > { %v760_v59 = vpop.permute.xlu0 %759 }
 0x258   : > { %770 = vst.msk [vmem:[%s316_s11 + $0x8] sm:$0xff] %vm741_vm12, %v760_v59 }
 0x259 PF: > { %p18_p7 = scmp.ge.s32.totalorder %s1116_s29, 4   ;;  %s1485_s24 = smov %s1041_s25 }
 0x25a   : > { %s1486_s25 = smov %s1045_s26  ;;  %s1487_s26 = smov %s1126_s9 }
 0x25b   : > { %s1488_s27 = smov %s1116_s29  ;;  %20 = sbr.rel (!%p18_p7) target bundleno = 3 (0x3), region = 96 }
 0x260   :  { %812 = vsyncpa [#allocation3], 1 }
 0x261   :  { %814 = vsyncpa [#allocation3 + $0x1], 1 }

</bundles_post_ra>
